<compile_context>
chip_gen: v5e
topology: v5e:2x2
jax: 0.10.0
libtpu: 0.0.40
codegen_flags: <defaults>
</compile_context>

<pallas_src>
import functools

import jax
import jax.numpy as jnp
from jax.experimental import pallas as pl
from jax.experimental.pallas import tpu as pltpu

LN_EPS = 1e-5    # torch.nn.LayerNorm default
HIDDEN = 128     # nn.Linear(input_size, 128)


def _round_up(x, m):
    return ((x + m - 1) // m) * m


def _vmem_capacity_bytes():
    """Physical VMEM of the current TPU generation (fallback: v7x's 64 MiB)."""
    try:
        info = pltpu.get_tpu_info()
        cap = int(getattr(info, "vmem_capacity_bytes", 0) or 0)
        if cap > 0:
            return min(cap, 128 * 1024 * 1024)
    except Exception:
        pass
    return 64 * 1024 * 1024


def mlp_kernel(x_ref, w1_ref, b1_ref, w2_ref, b2_ref, gamma_ref, beta_ref,
               o_ref, *, d_out, d_pad, apply_ln):
    # ---- fc1 + ReLU (MXU matmul, f32 accumulation) ----
    x = x_ref[...]
    if x.dtype != w1_ref.dtype:              # bf16 path: per-tile cast in VMEM
        x = x.astype(w1_ref.dtype)
    h = jnp.dot(x, w1_ref[...], preferred_element_type=jnp.float32)
    h = jnp.maximum(h + b1_ref[...], 0.0)     # b1 is (1, 128), broadcasts

    # ---- fc2 (output lane axis padded to a multiple of 128 by the wrapper) ----
    if w2_ref.dtype != h.dtype:
        h = h.astype(w2_ref.dtype)
    y = jnp.dot(h, w2_ref[...], preferred_element_type=jnp.float32)
    y = y + b2_ref[...]

    if not apply_ln:
        o_ref[...] = y.astype(o_ref.dtype)
        return

    # ---- LayerNorm over the first d_out lanes ----
    inv_n = 1.0 / d_out
    if d_pad == d_out:                        # no padded lanes -> no mask work
        mean = jnp.sum(y, axis=-1, keepdims=True) * inv_n
        centered = y - mean
    else:
        col = jax.lax.broadcasted_iota(jnp.int32, y.shape, 1)
        valid = col < d_out
        y = jnp.where(valid, y, 0.0)          # robust: stats never see padding
        mean = jnp.sum(y, axis=-1, keepdims=True) * inv_n
        centered = jnp.where(valid, y - mean, 0.0)
    var = jnp.sum(centered * centered, axis=-1, keepdims=True) * inv_n
    out = centered * jax.lax.rsqrt(var + LN_EPS) * gamma_ref[...] + beta_ref[...]
    o_ref[...] = out.astype(o_ref.dtype)


def mlp_forward(x, w1, b1, w2, b2, gamma, beta, *,
                layer_norm=True, use_bf16_matmul=False,
                out_dtype=jnp.float32, max_rows_per_tile=1024):
    """x: (B, D_in); w1: (D_in, 128); w2: (128, D_out); biases/gamma/beta 1-D.

    Weights are stored (in, out) so the kernel computes x @ W + b, equivalent
    to PyTorch's x @ W.T + b with W of shape (out, in)."""
    B, D_in = x.shape
    D_out = w2.shape[1]

    # Lane-dense output: pad the second-layer feature axis to a multiple of 128
    # so output stores are full-width (unmasked vst).  Padded w2 cols / b2 /
    # beta lanes are zero, gamma padding is one.
    D_pad = _round_up(D_out, 128)
    pad_f = D_pad - D_out
    w2p = jnp.pad(w2, ((0, 0), (0, pad_f)))
    b2p = jnp.pad(b2.reshape(1, -1), ((0, 0), (0, pad_f)))
    gammap = jnp.pad(gamma.reshape(1, -1), ((0, 0), (0, pad_f)),
                     constant_values=1.0)
    betap = jnp.pad(beta.reshape(1, -1), ((0, 0), (0, pad_f)))
    b1r = b1.reshape(1, -1)

    w1c = w1
    if use_bf16_matmul:
        # Cast the small weights once here; x is cast per-tile inside the
        # kernel so no extra HBM pass over the activations is introduced.
        w1c = w1.astype(jnp.bfloat16)
        w2p = w2p.astype(jnp.bfloat16)

    # ---- per-generation VMEM budgeting for the batch tile -------------------
    out_itemsize = jnp.dtype(out_dtype).itemsize
    weight_bytes = (w1c.size * w1c.dtype.itemsize
                    + b1r.size * b1r.dtype.itemsize
                    + w2p.size * w2p.dtype.itemsize
                    + (b2p.size + gammap.size + betap.size) * 4)
    vmem_capacity = _vmem_capacity_bytes()        # 64 MiB v7x / 128 MiB v5e,v6e
    vmem_limit = (vmem_capacity * 5) // 8         # ~40 MiB v7x, ~80 MiB v5e/v6e
    per_row = 2 * D_in * x.dtype.itemsize + 2 * D_pad * out_itemsize  # 2x-buffered
    tile_budget = max(vmem_limit - 2 * weight_bytes - (2 << 20), 8 * per_row)

    TB = max(8, ((tile_budget // per_row) // 8) * 8)
    TB = min(TB, max_rows_per_tile)
    if B >= 32:
        # Keep >= 4 grid steps so the "parallel" axis feeds both v7x TensorCores.
        while TB > 8 and pl.cdiv(B, TB) < 4:
            TB = max(8, ((TB // 2) // 8) * 8)
    if TB >= B:
        TB = B                                     # single full-batch block

    grid = (pl.cdiv(B, TB),)                       # ragged last block is handled
    resident = lambda shape: pl.BlockSpec(shape, lambda i: (0, 0))

    cost = pl.CostEstimate(
        flops=2 * B * (D_in * HIDDEN + HIDDEN * D_pad),
        transcendentals=B,                         # one rsqrt per row
        bytes_accessed=(B * D_in * x.dtype.itemsize
                        + B * D_pad * out_itemsize + weight_bytes),
    )

    out = pl.pallas_call(
        functools.partial(mlp_kernel, d_out=D_out, d_pad=D_pad,
                          apply_ln=layer_norm),
        out_shape=jax.ShapeDtypeStruct((B, D_pad), out_dtype),
        grid=grid,
        in_specs=[
            pl.BlockSpec((TB, D_in), lambda i: (i, 0)),   # x: tiled over batch
            resident((D_in, HIDDEN)),                     # w1 (VMEM-resident)
            resident((1, HIDDEN)),                        # b1
            resident((HIDDEN, D_pad)),                    # w2 (lane-padded)
            resident((1, D_pad)),                         # b2
            resident((1, D_pad)),                         # gamma
            resident((1, D_pad)),                         # beta
        ],
        out_specs=pl.BlockSpec((TB, D_pad), lambda i: (i, 0)),
        compiler_params=pltpu.CompilerParams(
            dimension_semantics=("parallel",),
            vmem_limit_bytes=int(vmem_limit),
        ),
        cost_estimate=cost,
    )(x, w1c, b1r, w2p, b2p, gammap, betap)

    if pad_f:
        # TODO(synk): consumers that tolerate the lane-padded slab can take
        # `out` directly and skip this extra slice pass over HBM.
        out = out[:, :D_out]
    return out


def reference_forward(x, w1, b1, w2, b2, gamma, beta, layer_norm=True):
    h = jnp.maximum(x @ w1 + b1, 0.0)
    y = h @ w2 + b2
    if not layer_norm:
        return y
    mean = jnp.mean(y, axis=-1, keepdims=True)
    var = jnp.mean((y - mean) ** 2, axis=-1, keepdims=True)
    return (y - mean) / jnp.sqrt(var + LN_EPS) * gamma + beta


if __name__ == "__main__":
    # Make the jnp reference matmuls f32-accurate so the 1e-4 check is fair.
    jax.config.update("jax_default_matmul_precision", "highest")

    key = jax.random.PRNGKey(0)

    def make_params(k, d_in, d_out):
        ks = jax.random.split(k, 6)
        w1 = jax.random.normal(ks[0], (d_in, HIDDEN), jnp.float32) * 0.1
        b1 = jax.random.normal(ks[1], (HIDDEN,), jnp.float32) * 0.1
        w2 = jax.random.normal(ks[2], (HIDDEN, d_out), jnp.float32) * 0.1
        b2 = jax.random.normal(ks[3], (d_out,), jnp.float32) * 0.1
        gamma = 1.0 + 0.1 * jax.random.normal(ks[4], (d_out,), jnp.float32)
        beta = 0.1 * jax.random.normal(ks[5], (d_out,), jnp.float32)
        return w1, b1, w2, b2, gamma, beta

    k0, k1, k2, k3 = jax.random.split(key, 4)

    # Config 1: small batch, D_out=64 (lane-padded output + masked-LN path).
    B, D_in, D_out = 8, 32, 64
    x = jax.random.normal(k0, (B, D_in), jnp.float32)
    params = make_params(k1, D_in, D_out)
    out = jax.block_until_ready(mlp_forward(x, *params))
    ref = reference_forward(x, *params)
    assert out.shape == (B, D_out)
    assert jnp.max(jnp.abs(out - ref)) < 1e-4, float(jnp.max(jnp.abs(out - ref)))

    # Config 2: ragged multi-step batch grid (B=20, TB=8 -> 3 steps, last block
    # partially valid) and D_out already lane-aligned (unmasked-LN fast path).
    B2, D_in2, D_out2 = 20, 32, 128
    x2 = jax.random.normal(k2, (B2, D_in2), jnp.float32)
    params2 = make_params(k3, D_in2, D_out2)
    out2 = jax.block_until_ready(mlp_forward(x2, *params2, max_rows_per_tile=8))
    ref2 = reference_forward(x2, *params2)
    assert out2.shape == (B2, D_out2)
    assert jnp.max(jnp.abs(out2 - ref2)) < 1e-4, float(jnp.max(jnp.abs(out2 - ref2)))

    print("KERNEL_OK")
</pallas_src>

<mosaic_0001>
module attributes {stable_mosaic.version = 11 : i64} {
  func.func @mlp_kernel(%arg0: i32, %arg1: memref<8x32xf32, #tpu.memory_space<vmem>>, %arg2: memref<32x128xf32, #tpu.memory_space<vmem>>, %arg3: memref<1x128xf32, #tpu.memory_space<vmem>>, %arg4: memref<128x128xf32, #tpu.memory_space<vmem>>, %arg5: memref<1x128xf32, #tpu.memory_space<vmem>>, %arg6: memref<1x128xf32, #tpu.memory_space<vmem>>, %arg7: memref<1x128xf32, #tpu.memory_space<vmem>>, %arg8: memref<8x128xf32, #tpu.memory_space<vmem>>) attributes {dimension_semantics = [#tpu.dimension_semantics<parallel>], iteration_bounds = array<i64: 1>, scalar_prefetch = 0 : i64, scratch_operands = 0 : i64, tpu.core_type = #tpu.core_type<tc>, window_params = [{transform_indices = @transform_0, window_bounds = array<i64: 8, 32>}, {pipeline_mode = #tpu.pipeline_mode<synchronous>, transform_indices = @transform_1, window_bounds = array<i64: 32, 128>}, {pipeline_mode = #tpu.pipeline_mode<synchronous>, transform_indices = @transform_2, window_bounds = array<i64: 1, 128>}, {pipeline_mode = #tpu.pipeline_mode<synchronous>, transform_indices = @transform_3, window_bounds = array<i64: 128, 128>}, {pipeline_mode = #tpu.pipeline_mode<synchronous>, transform_indices = @transform_4, window_bounds = array<i64: 1, 128>}, {pipeline_mode = #tpu.pipeline_mode<synchronous>, transform_indices = @transform_5, window_bounds = array<i64: 1, 128>}, {pipeline_mode = #tpu.pipeline_mode<synchronous>, transform_indices = @transform_6, window_bounds = array<i64: 1, 128>}, {transform_indices = @transform_7, window_bounds = array<i64: 8, 128>}]} {
    %c0 = arith.constant 0 : index
    %c0_0 = arith.constant 0 : index
    %0 = vector.load %arg1[%c0, %c0_0] : memref<8x32xf32, #tpu.memory_space<vmem>>, vector<8x32xf32>
    %c0_1 = arith.constant 0 : index
    %c0_2 = arith.constant 0 : index
    %1 = vector.load %arg2[%c0_1, %c0_2] : memref<32x128xf32, #tpu.memory_space<vmem>>, vector<32x128xf32>
    %cst = arith.constant dense<0.000000e+00> : vector<8x128xf32>
    %2 = tpu.matmul %0, %1, %cst {dimension_numbers = #tpu.dot_dimension_numbers<[1], [0], [0], [1], [0, 0, 1, 1], [], []>, precision = #tpu.contract_precision<fp32>} : vector<8x32xf32>, vector<32x128xf32>, vector<8x128xf32> -> vector<8x128xf32>
    %c0_3 = arith.constant 0 : index
    %c0_4 = arith.constant 0 : index
    %3 = vector.load %arg3[%c0_3, %c0_4] : memref<1x128xf32, #tpu.memory_space<vmem>>, vector<1x128xf32>
    %4 = vector.broadcast %3 : vector<1x128xf32> to vector<8x128xf32>
    %5 = arith.addf %2, %4 : vector<8x128xf32>
    %cst_5 = arith.constant 0.000000e+00 : f32
    %6 = vector.broadcast %cst_5 : f32 to vector<8x128xf32>
    %7 = arith.maximumf %5, %6 : vector<8x128xf32>
    %c0_6 = arith.constant 0 : index
    %c0_7 = arith.constant 0 : index
    %8 = vector.load %arg4[%c0_6, %c0_7] : memref<128x128xf32, #tpu.memory_space<vmem>>, vector<128x128xf32>
    %cst_8 = arith.constant dense<0.000000e+00> : vector<8x128xf32>
    %9 = tpu.matmul %7, %8, %cst_8 {dimension_numbers = #tpu.dot_dimension_numbers<[1], [0], [0], [1], [0, 0, 1, 1], [], []>, precision = #tpu.contract_precision<fp32>} : vector<8x128xf32>, vector<128x128xf32>, vector<8x128xf32> -> vector<8x128xf32>
    %c0_9 = arith.constant 0 : index
    %c0_10 = arith.constant 0 : index
    %10 = vector.load %arg5[%c0_9, %c0_10] : memref<1x128xf32, #tpu.memory_space<vmem>>, vector<1x128xf32>
    %11 = vector.broadcast %10 : vector<1x128xf32> to vector<8x128xf32>
    %12 = arith.addf %9, %11 : vector<8x128xf32>
    %13 = tpu.iota {dimensions = array<i32: 1>} : vector<8x128xi32>
    %c64_i32 = arith.constant 64 : i32
    %14 = vector.broadcast %c64_i32 : i32 to vector<8x128xi32>
    %15 = arith.cmpi slt, %13, %14 : vector<8x128xi32>
    %cst_11 = arith.constant 0.000000e+00 : f32
    %16 = vector.broadcast %cst_11 : f32 to vector<8x128xf32>
    %17 = arith.select %15, %12, %16 : vector<8x128xi1>, vector<8x128xf32>
    %cst_12 = arith.constant dense<0.000000e+00> : vector<8xf32>
    %18 = vector.multi_reduction <add>, %17, %cst_12 [1] : vector<8x128xf32> to vector<8xf32>
    %19 = vector.shape_cast %18 : vector<8xf32> to vector<8x1xf32>
    %cst_13 = arith.constant 1.562500e-02 : f32
    %20 = vector.broadcast %cst_13 : f32 to vector<8x1xf32>
    %21 = arith.mulf %19, %20 : vector<8x1xf32>
    %22 = vector.broadcast %21 : vector<8x1xf32> to vector<8x128xf32>
    %23 = arith.subf %17, %22 : vector<8x128xf32>
    %cst_14 = arith.constant 0.000000e+00 : f32
    %24 = vector.broadcast %cst_14 : f32 to vector<8x128xf32>
    %25 = arith.select %15, %23, %24 : vector<8x128xi1>, vector<8x128xf32>
    %26 = arith.mulf %25, %25 : vector<8x128xf32>
    %cst_15 = arith.constant dense<0.000000e+00> : vector<8xf32>
    %27 = vector.multi_reduction <add>, %26, %cst_15 [1] : vector<8x128xf32> to vector<8xf32>
    %28 = vector.shape_cast %27 : vector<8xf32> to vector<8x1xf32>
    %cst_16 = arith.constant 1.562500e-02 : f32
    %29 = vector.broadcast %cst_16 : f32 to vector<8x1xf32>
    %30 = arith.mulf %28, %29 : vector<8x1xf32>
    %cst_17 = arith.constant 9.99999974E-6 : f32
    %31 = vector.broadcast %cst_17 : f32 to vector<8x1xf32>
    %32 = arith.addf %30, %31 : vector<8x1xf32>
    %33 = math.rsqrt %32 : vector<8x1xf32>
    %34 = vector.broadcast %33 : vector<8x1xf32> to vector<8x128xf32>
    %35 = arith.mulf %25, %34 : vector<8x128xf32>
    %c0_18 = arith.constant 0 : index
    %c0_19 = arith.constant 0 : index
    %36 = vector.load %arg6[%c0_18, %c0_19] : memref<1x128xf32, #tpu.memory_space<vmem>>, vector<1x128xf32>
    %37 = vector.broadcast %36 : vector<1x128xf32> to vector<8x128xf32>
    %38 = arith.mulf %35, %37 : vector<8x128xf32>
    %c0_20 = arith.constant 0 : index
    %c0_21 = arith.constant 0 : index
    %39 = vector.load %arg7[%c0_20, %c0_21] : memref<1x128xf32, #tpu.memory_space<vmem>>, vector<1x128xf32>
    %40 = vector.broadcast %39 : vector<1x128xf32> to vector<8x128xf32>
    %41 = arith.addf %38, %40 : vector<8x128xf32>
    %c0_22 = arith.constant 0 : index
    %c0_23 = arith.constant 0 : index
    %42 = vector.load %arg8[%c0_22, %c0_23] : memref<8x128xf32, #tpu.memory_space<vmem>>, vector<8x128xf32>
    tpu.vector_store %arg8[%c0_22, %c0_23], %41 {strides = array<i32>} : memref<8x128xf32, #tpu.memory_space<vmem>>, vector<8x128xf32>,
    return
  }
  func.func @transform_0(%arg0: i32) -> (i32, i32) {
    %c0_i32 = arith.constant 0 : i32
    %c0_i32_0 = arith.constant 0 : i32
    return %arg0, %c0_i32 : i32, i32
  }
  func.func @transform_1(%arg0: i32) -> (i32, i32) {
    %c0_i32 = arith.constant 0 : i32
    %c0_i32_0 = arith.constant 0 : i32
    %c0_i32_1 = arith.constant 0 : i32
    return %c0_i32, %c0_i32_0 : i32, i32
  }
  func.func @transform_2(%arg0: i32) -> (i32, i32) {
    %c0_i32 = arith.constant 0 : i32
    %c0_i32_0 = arith.constant 0 : i32
    %c0_i32_1 = arith.constant 0 : i32
    return %c0_i32, %c0_i32_0 : i32, i32
  }
  func.func @transform_3(%arg0: i32) -> (i32, i32) {
    %c0_i32 = arith.constant 0 : i32
    %c0_i32_0 = arith.constant 0 : i32
    %c0_i32_1 = arith.constant 0 : i32
    return %c0_i32, %c0_i32_0 : i32, i32
  }
  func.func @transform_4(%arg0: i32) -> (i32, i32) {
    %c0_i32 = arith.constant 0 : i32
    %c0_i32_0 = arith.constant 0 : i32
    %c0_i32_1 = arith.constant 0 : i32
    return %c0_i32, %c0_i32_0 : i32, i32
  }
  func.func @transform_5(%arg0: i32) -> (i32, i32) {
    %c0_i32 = arith.constant 0 : i32
    %c0_i32_0 = arith.constant 0 : i32
    %c0_i32_1 = arith.constant 0 : i32
    return %c0_i32, %c0_i32_0 : i32, i32
  }
  func.func @transform_6(%arg0: i32) -> (i32, i32) {
    %c0_i32 = arith.constant 0 : i32
    %c0_i32_0 = arith.constant 0 : i32
    %c0_i32_1 = arith.constant 0 : i32
    return %c0_i32, %c0_i32_0 : i32, i32
  }
  func.func @transform_7(%arg0: i32) -> (i32, i32) {
    %c0_i32 = arith.constant 0 : i32
    %c0_i32_0 = arith.constant 0 : i32
    return %arg0, %c0_i32 : i32, i32
  }
}

</mosaic_0001>

<bundles_post_ra>
// kernel: tpu_custom_call.1
= control target key start
LH: loop header
LB: loop body
LE: loop exit
PB: predicated region body
PF: predicated region fallthrough
CT: control target
= control target key end

     0   :  { %12 = vsyncpa [#allocation3], 0  ;;  %s1140_s0 = inlined_call_operand.hbm [shape: f32[8,32], index: 0, kind: input, shape index: {}]   ;;  %s1141_s1 = inlined_call_operand.hbm [shape: f32[32,128], index: 1, kind: input, shape index: {}]   ;;  %s1142_s2 = inlined_call_operand.vmem [shape: f32[1,128], index: 2, kind: input, shape index: {}]   ;;  %s1143_s3 = inlined_call_operand.hbm [shape: f32[128,128], index: 3, kind: input, shape index: {}]   ;;  %s1144_s4 = inlined_call_operand.vmem [shape: f32[1,128], index: 4, kind: input, shape index: {}]   ;;  %s1145_s5 = inlined_call_operand.vmem [shape: f32[1,128], index: 5, kind: input, shape index: {}]   ;;  %s1146_s6 = inlined_call_operand.vmem [shape: f32[1,128], index: 6, kind: input, shape index: {}]   ;;  %s1147_s7 = inlined_call_operand.hbm [shape: f32[8,128], index: 7, kind: output, shape index: {}]  }
   0x1   :  { %13 = vsyncpa [#allocation6], 0  ;;  %s30_s26 = sshll.u32 %s1141_s1, 4  ;;  %s31_s26 = int_to_ptr.hbm [resolvable:$true] %s30_s26 }
   0x2   :  { %14 = vsyncpa [#allocation4], 0  ;;  %s800_s27 = smov [#allocation5]   ;;  %s20_s8 = sshll.u32 %s1140_s0, 4  ;;  %s21_s8 = int_to_ptr.hbm [resolvable:$true] %s20_s8 }
   0x3   :  { %s32_s28 = sshll.u32 %s800_s27, 4  ;;  %s801_s9 = smov 128   ;;  %s33_s28 = int_to_ptr.vmem [resolvable:$true] %s32_s28 }
   0x4   :  { %s802_s10 = smov 8   ;;  %s803_s11 = smov [#allocation2]  }
   0x5   :  { %38 = dma.hbm_to_vmem [thread:$0]  %s31_s26, 512, %s33_s28, [#allocation6], %s801_s9, %s801_s9, %s802_s10  }
   0x6   :  { %s22_s12 = sshll.u32 %s803_s11, 4  ;;  %s45_s15 = sshll.u32 %s1143_s3, 4  ;;  %s23_s12 = int_to_ptr.vmem [resolvable:$true] %s22_s12  ;;  %s46_s15 = int_to_ptr.hbm [resolvable:$true] %s45_s15 }
   0x7   :  { %25 = dma.hbm_to_vmem [thread:$0]  %s21_s8, 128, %s23_s12, [#allocation3]  }
   0x8   :  { %s804_s1 = smov [#allocation7]  }
   0x9   :  { %s47_s16 = sshll.u32 %s804_s1, 4  ;;  %s48_s16 = int_to_ptr.vmem [resolvable:$true] %s47_s16 }
   0xa   :  { %53 = dma.hbm_to_vmem [thread:$0]  %s46_s15, 2048, %s48_s16, [#allocation6], %s801_s9, %s801_s9, %s802_s10  }
   0xb   :  { %794 = dma.done.wait [#allocation3], 128  }
   0xc   :  { %795 = vsyncadd [#allocation3], 4294967168 }
   0xd   :  { %796 = dma.done.wait [#allocation6], 2560  }
   0xe   :  { %797 = vsyncadd [#allocation6], 4294964736  ;;  %vm81_vm0 = vcmask 261120   ;;  %v76_v0 = vld [vmem:[#allocation5 + $0x18] sm:$0xff]  ;;  %v75_v1 = vld [vmem:[#allocation5 + $0x10] sm:$0xff]  ;;  %s805_s21 = smov [#allocation8]  }
   0xf   :  { %v74_v2 = vld [vmem:[#allocation5 + $0x8] sm:$0xff]  ;;  %v855_v3 = vand.u32 4294901760, %v76_v0  ;;  %v857_v4 = vand.u32 4294901760, %v75_v1  ;;  %v73_v6 = vld [vmem:[#allocation5] sm:$0xff]  ;;  %v72_v7 = vld [vmem:[#allocation2] sm:$0xff]  ;;  %s673_s22 = sshll.u32 %s805_s21, 4  ;;  %s674_s22 = int_to_ptr.vmem [resolvable:$true] %s673_s22 }
  0x10   :  { %v859_v5 = vand.u32 4294901760, %v74_v2  ;;  %v861_v8 = vand.u32 4294901760, %v73_v6  ;;  %v83_v9 = vsel %vm81_vm0, %v72_v7, 0  ;;  %v286_v10 = vld [vmem:[#allocation7 + $0x78] sm:$0xff]  ;;  %v285_v11 = vld [vmem:[#allocation7 + $0x70] sm:$0xff]  ;;  %v284_v12 = vld [vmem:[#allocation7 + $0x68] sm:$0xff] }
  0x11   :  { %98 = vmatpush.msra.mxu0 %v855_v3  ;;  %v865_v13 = vsub.f32 %v76_v0, %v855_v3  ;;  %v867_v14 = vand.u32 4294901760, %v83_v9  ;;  %v870_v15 = vsub.f32 %v75_v1, %v857_v4  ;;  %v878_v18 = vand.u32 4294901760, %v286_v10  ;;  %v283_v37 = vld [vmem:[#allocation7 + $0x60] sm:$0xff]  ;;  %v282_v38 = vld [vmem:[#allocation7 + $0x58] sm:$0xff]  ;;  %v281_v39 = vld [vmem:[#allocation7 + $0x50] sm:$0xff]  ;;  %s675_s25 = sshll.u32 %s1147_s7, 4  ;;  %s676_s25 = int_to_ptr.hbm [resolvable:$true] %s675_s25 }
  0x12   :  { %v873_v16 = vsub.f32 %v74_v2, %v859_v5  ;;  %v876_v17 = vsub.f32 %v73_v6, %v861_v8  ;;  %v880_v19 = vand.u32 4294901760, %v285_v11  ;;  %v882_v20 = vand.u32 4294901760, %v284_v12  ;;  %v280_v43 = vld [vmem:[#allocation7 + $0x48] sm:$0xff]  ;;  %v279_v48 = vld [vmem:[#allocation7 + $0x40] sm:$0xff]  ;;  %v278_v53 = vld [vmem:[#allocation7 + $0x38] sm:$0xff] }
  0x13   :  { %100 = vmatpush.msra.mxu0 %v857_v4  ;;  %v128_v21 = vand.u32 4294901760, %v865_v13  ;;  %v887_v22 = vsub.f32 %v83_v9, %v867_v14  ;;  %v134_v23 = vand.u32 4294901760, %v870_v15  ;;  %v893_v26 = vsub.f32 %v286_v10, %v878_v18  ;;  %292 = vmatpush.msra.mxu2 %v878_v18  ;;  %v277_v54 = vld [vmem:[#allocation7 + $0x30] sm:$0xff]  ;;  %v276_v63 = vld [vmem:[#allocation7 + $0x28] sm:$0xff] }
  0x14   :  { %v140_v24 = vand.u32 4294901760, %v873_v16  ;;  %v146_v25 = vand.u32 4294901760, %v876_v17  ;;  %v896_v27 = vsub.f32 %v285_v11, %v880_v19  ;;  %v899_v28 = vsub.f32 %v284_v12, %v882_v20 }
  0x15   :  { %102 = vmatpush.msra.mxu0 %v859_v5  ;;  %v129_v29 = vsub.f32 %v865_v13, %v128_v21  ;;  %v107_v30 = vand.u32 4294901760, %v887_v22  ;;  %v135_v31 = vsub.f32 %v870_v15, %v134_v23  ;;  %v334_v34 = vand.u32 4294901760, %v893_v26  ;;  %294 = vmatpush.msra.mxu2 %v880_v19 }
  0x16   :  { %v141_v32 = vsub.f32 %v873_v16, %v140_v24  ;;  %v147_v33 = vsub.f32 %v876_v17, %v146_v25  ;;  %v340_v35 = vand.u32 4294901760, %v896_v27  ;;  %v346_v36 = vand.u32 4294901760, %v899_v28 }
  0x17   :  { %104 = vmatpush.msra.mxu0 %v861_v8  ;;  %v130_v40 = vand.u32 4294901760, %v129_v29  ;;  %v108_v41 = vsub.f32 %v887_v22, %v107_v30  ;;  %v136_v42 = vand.u32 4294901760, %v135_v31  ;;  %v335_v45 = vsub.f32 %v893_v26, %v334_v34  ;;  %296 = vmatpush.msra.mxu2 %v882_v20 }
  0x18   :  { %v142_v44 = vand.u32 4294901760, %v141_v32  ;;  %v341_v46 = vsub.f32 %v896_v27, %v340_v35  ;;  %v347_v47 = vsub.f32 %v899_v28, %v346_v36  ;;  %v935_v50 = vand.u32 4294901760, %v283_v37 }
  0x19   :  { %169 = vmatpush.msrb.mxu0 %v865_v13  ;;  %131 = vmatpush.msra.mxu1 %v130_v40  ;;  %v109_v49 = vand.u32 4294901760, %v108_v41  ;;  %v937_v51 = vand.u32 4294901760, %v282_v38  ;;  %v939_v52 = vand.u32 4294901760, %v281_v39  ;;  %v148_v55 = vand.u32 4294901760, %v147_v33 }
  0x1a   :  { %v336_v56 = vand.u32 4294901760, %v335_v45  ;;  %v342_v57 = vand.u32 4294901760, %v341_v46  ;;  %v942_v58 = vand.u32 4294901760, %v280_v43  ;;  %v945_v59 = vsub.f32 %v283_v37, %v935_v50  ;;  %298 = vmatpush.msra.mxu2 %v935_v50 }
  0x1b   :  { %172 = vmatpush.msrb.mxu0 %v870_v15  ;;  %137 = vmatpush.msra.mxu1 %v136_v42  ;;  %v948_v60 = vsub.f32 %v282_v38, %v937_v51  ;;  %v951_v61 = vsub.f32 %v281_v39, %v939_v52  ;;  %v953_v62 = vand.u32 4294901760, %v279_v48  ;;  %v348_v0 = vand.u32 4294901760, %v347_v47  ;;  %v274_v39 = vld [vmem:[#allocation7 + $0x18] sm:$0xff] }
  0x1c   :  { %110 = vmatmul.f32.vlgmr.msra.gmra.mxu0 %v109_v49  ;;  %337 = vmatpush.msra.mxu3 %v336_v56  ;;  %v957_v1 = vsub.f32 %v280_v43, %v942_v58  ;;  %v959_v2 = vand.u32 4294901760, %v278_v53  ;;  %v961_v6 = vand.u32 4294901760, %v277_v54  ;;  %v352_v7 = vand.u32 4294901760, %v945_v59 }
  0x1d   :  { %175 = vmatpush.msrb.mxu0 %v873_v16  ;;  %143 = vmatpush.msra.mxu1 %v142_v44  ;;  %v358_v9 = vand.u32 4294901760, %v948_v60  ;;  %v364_v10 = vand.u32 4294901760, %v951_v61  ;;  %v968_v11 = vsub.f32 %v279_v48, %v953_v62  ;;  %v975_v31 = vand.u32 4294901760, %v276_v63 }
  0x1e   :  { %343 = vmatpush.msra.mxu3 %v342_v57  ;;  %v370_v12 = vand.u32 4294901760, %v957_v1  ;;  %v973_v29 = vsub.f32 %v278_v53, %v959_v2  ;;  %v353_v32 = vsub.f32 %v945_v59, %v352_v7  ;;  %v991_v13 = vsub.f32 %v277_v54, %v961_v6  ;;  %300 = vmatpush.msra.mxu2 %v937_v51 }
  0x1f   :  { %178 = vmatpush.msrb.mxu0 %v876_v17  ;;  %149 = vmatpush.msra.mxu1 %v148_v55  ;;  %v359_v33 = vsub.f32 %v948_v60, %v358_v9  ;;  %v365_v37 = vsub.f32 %v951_v61, %v364_v10  ;;  %v376_v38 = vand.u32 4294901760, %v968_v11  ;;  %v1002_v44 = vsub.f32 %v276_v63, %v975_v31 }
  0x20   :  { %151 = vmatmul.f32.vlgmr.msra.gmra.mxu1 %v867_v14  ;;  %349 = vmatpush.msra.mxu3 %v348_v0  ;;  %v354_v40 = vand.u32 4294901760, %v353_v32  ;;  %v371_v42 = vsub.f32 %v957_v1, %v370_v12  ;;  %v382_v43 = vand.u32 4294901760, %v973_v29  ;;  %v1008_v15 = vand.u32 4294901760, %v274_v39  ;;  %v272_v0 = vld [vmem:[#allocation7 + $0x8] sm:$0xff] }
  0x21   :  { %227 = vmatpush.msra.mxu0 %v128_v21  ;;  %v275_v21 = vld [vmem:[#allocation7 + $0x20] sm:$0xff]  ;;  %198 = vmatpush.msrb.mxu1 %v855_v3  ;;  %v360_v41 = vand.u32 4294901760, %v359_v33  ;;  %v377_v46 = vsub.f32 %v968_v11, %v376_v38  ;;  %v388_v47 = vand.u32 4294901760, %v991_v13  ;;  %v394_v49 = vand.u32 4294901760, %v1002_v44 }
  0x22   :  { %v1006_v45 = vand.u32 4294901760, %v275_v21  ;;  %355 = vmatpush.msra.mxu3 %v354_v40  ;;  %302 = vmatpush.msra.mxu2 %v939_v52  ;;  %v372_v16 = vand.u32 4294901760, %v371_v42  ;;  %v1028_v53 = vsub.f32 %v274_v39, %v1008_v15  ;;  %v319_v33 = vand.u32 4294901760, %v272_v0 }
  0x23   :  { %231 = vmatpush.msra.mxu0 %v134_v23  ;;  %200 = vmatpush.msrb.mxu1 %v857_v4  ;;  %v366_v23 = vand.u32 4294901760, %v365_v37  ;;  %v378_v17 = vand.u32 4294901760, %v377_v46  ;;  %v395_v56 = vsub.f32 %v1002_v44, %v394_v49  ;;  %v271_v37 = vld [vmem:[#allocation7] sm:$0xff] }
  0x24   :  { %181 = vmatmul.f32.vlgmr.msrb.gmra.mxu0 %v887_v22  ;;  %v1019_v48 = vsub.f32 %v275_v21, %v1006_v45  ;;  %361 = vmatpush.msra.mxu3 %v360_v41  ;;  %v406_v22 = vand.u32 4294901760, %v1028_v53  ;;  %v417_v39 = vsub.f32 %v272_v0, %v319_v33  ;;  %v321_v40 = vand.u32 4294901760, %v271_v37 }
  0x25   :  { %235 = vmatpush.msra.mxu0 %v140_v24  ;;  %202 = vmatpush.msrb.mxu1 %v859_v5  ;;  %v383_v24 = vsub.f32 %v973_v29, %v382_v43  ;;  %v396_v57 = vand.u32 4294901760, %v395_v56 }
  0x26   :  { %304 = vmatpush.msra.mxu2 %v942_v58  ;;  %367 = vmatpush.msra.mxu3 %v366_v23  ;;  %v400_v54 = vand.u32 4294901760, %v1019_v48  ;;  %v407_v63 = vsub.f32 %v1028_v53, %v406_v22  ;;  %v418_v42 = vand.u32 4294901760, %v417_v39  ;;  %v423_v23 = vsub.f32 %v271_v37, %v321_v40 }
  0x27   :  { %239 = vmatpush.msra.mxu0 %v146_v25  ;;  %204 = vmatpush.msrb.mxu1 %v861_v8  ;;  %v389_v25 = vsub.f32 %v991_v13, %v388_v47  ;;  %v384_v55 = vand.u32 4294901760, %v383_v24 }
  0x28   :  { %208 = vmatmul.f32.vlgmr.msrb.gmra.mxu1 %v107_v30  ;;  %306 = vmatpush.msra.mxu2 %v953_v62  ;;  %v424_v24 = vand.u32 4294901760, %v423_v23 }
  0x29   :  { %258 = vmatpush.msra.mxu1 %v855_v3  ;;  %373 = vmatpush.msra.mxu3 %v372_v16  ;;  %v390_v30 = vand.u32 4294901760, %v389_v25  ;;  %v401_v3 = vsub.f32 %v1019_v48, %v400_v54  ;;  %v419_v16 = vsub.f32 %v417_v39, %v418_v42 }
  0x2a   :  { %435 = vmatpush.msrb.mxu0 %v893_v26  ;;  %308 = vmatpush.msra.mxu2 %v959_v2  ;;  %v425_v25 = vsub.f32 %v423_v23, %v424_v24 }
  0x2b   :  { %260 = vmatpush.msra.mxu1 %v857_v4  ;;  %379 = vmatpush.msra.mxu3 %v378_v17  ;;  %v402_v4 = vand.u32 4294901760, %v401_v3  ;;  %v420_v17 = vand.u32 4294901760, %v419_v16 }
  0x2c   :  { %241 = vmatmul.f32.vlgmr.msra.gmra.mxu0 %v867_v14  ;;  %310 = vmatpush.msra.mxu2 %v961_v6 }
  0x2d   :  { %262 = vmatpush.msra.mxu1 %v859_v5  ;;  %438 = vmatpush.msrb.mxu0 %v896_v27  ;;  %v408_v5 = vand.u32 4294901760, %v407_v63 }
  0x2e   :  { %385 = vmatpush.msra.mxu3 %v384_v55  ;;  %312 = vmatpush.msra.mxu2 %v975_v31  ;;  %v426_v55 = vand.u32 4294901760, %v425_v25 }
  0x2f   :  { %264 = vmatpush.msra.mxu1 %v861_v8  ;;  %441 = vmatpush.msrb.mxu0 %v899_v28  ;;  %v273_v8 = vld [vmem:[#allocation7 + $0x10] sm:$0xff] }
  0x30   :  { %266 = vmatmul.f32.vlgmr.msra.gmra.mxu1 %v867_v14  ;;  %391 = vmatpush.msra.mxu3 %v390_v30  ;;  %v317_v14 = vand.u32 4294901760, %v273_v8 }
  0x31   :  { %488 = vmatpush.msrb.mxu1 %v878_v18  ;;  %444 = vmatpush.msrb.mxu0 %v945_v59 }
  0x32   :  { %397 = vmatpush.msra.mxu3 %v396_v57  ;;  %314 = vmatpush.msra.mxu2 %v1006_v45  ;;  %v411_v32 = vsub.f32 %v273_v8, %v317_v14 }
  0x33   :  { %490 = vmatpush.msrb.mxu1 %v880_v19  ;;  %447 = vmatpush.msrb.mxu0 %v948_v60 }
  0x34   :  { %403 = vmatpush.msra.mxu3 %v402_v4  ;;  %316 = vmatpush.msra.mxu2 %v1008_v15  ;;  %v412_v21 = vand.u32 4294901760, %v411_v32 }
  0x35   :  { %492 = vmatpush.msrb.mxu1 %v882_v20  ;;  %450 = vmatpush.msrb.mxu0 %v951_v61 }
  0x36   :  { %409 = vmatpush.msra.mxu3 %v408_v5  ;;  %318 = vmatpush.msra.mxu2 %v317_v14  ;;  %v413_v41 = vsub.f32 %v411_v32, %v412_v21 }
  0x37   :  { %494 = vmatpush.msrb.mxu1 %v935_v50  ;;  %453 = vmatpush.msrb.mxu0 %v957_v1 }
  0x38   :  { %320 = vmatpush.msra.mxu2 %v319_v33  ;;  %v414_v46 = vand.u32 4294901760, %v413_v41 }
  0x39   :  { %496 = vmatpush.msrb.mxu1 %v937_v51  ;;  %456 = vmatpush.msrb.mxu0 %v968_v11  ;;  %v632_v11 = vlaneseq }
  0x3a   :  { %322 = vmatpush.msra.mxu2 %v321_v40  ;;  %415 = vmatpush.msra.mxu3 %v414_v46 }
  0x3b   :  { %498 = vmatpush.msrb.mxu1 %v939_v52  ;;  %459 = vmatpush.msrb.mxu0 %v973_v29 }
  0x3c   :  { %529 = vmatpush.msrb.mxu2 %v334_v34  ;;  %421 = vmatpush.msra.mxu3 %v420_v17 }
  0x3d   :  { %500 = vmatpush.msrb.mxu1 %v942_v58  ;;  %462 = vmatpush.msrb.mxu0 %v991_v13  ;;  %v633_v13 = vand.u32 127, %v632_v11 }
  0x3e   :  { %533 = vmatpush.msrb.mxu2 %v340_v35  ;;  %427 = vmatpush.msra.mxu3 %v426_v55 }
  0x3f   :  { %502 = vmatpush.msrb.mxu1 %v953_v62  ;;  %465 = vmatpush.msrb.mxu0 %v1002_v44  ;;  %vm634_vm1 = vcmp.lt.s32.totalorder %v633_v13, 64 }
  0x40   :  { %537 = vmatpush.msrb.mxu2 %v346_v36  ;;  %596 = vmatpush.msrb.mxu3 %v878_v18 }
  0x41   :  { %504 = vmatpush.msrb.mxu1 %v959_v2  ;;  %468 = vmatpush.msrb.mxu0 %v1019_v48 }
  0x42   :  { %541 = vmatpush.msrb.mxu2 %v352_v7  ;;  %598 = vmatpush.msrb.mxu3 %v880_v19  ;;  %v692_v19 = vld [vmem:[%s1142_s2] ss:$0 sm:$0xff] }
  0x43   :  { %506 = vmatpush.msrb.mxu1 %v961_v6  ;;  %471 = vmatpush.msrb.mxu0 %v1028_v53 }
  0x44   :  { %545 = vmatpush.msrb.mxu2 %v358_v9  ;;  %600 = vmatpush.msrb.mxu3 %v882_v20 }
  0x45   :  { %508 = vmatpush.msrb.mxu1 %v975_v31  ;;  %474 = vmatpush.msrb.mxu0 %v411_v32  ;;  %v694_v32 = vld [vmem:[%s1145_s5] ss:$0 sm:$0xff] }
  0x46   :  { %549 = vmatpush.msrb.mxu2 %v364_v10  ;;  %602 = vmatpush.msrb.mxu3 %v935_v50 }
  0x47   :  { %510 = vmatpush.msrb.mxu1 %v1006_v45  ;;  %477 = vmatpush.msrb.mxu0 %v417_v39 }
  0x48   :  { %553 = vmatpush.msrb.mxu2 %v370_v12  ;;  %604 = vmatpush.msrb.mxu3 %v937_v51 }
  0x49   :  { %512 = vmatpush.msrb.mxu1 %v1008_v15  ;;  %480 = vmatpush.msrb.mxu0 %v423_v23 }
  0x4a   :  { %557 = vmatpush.msrb.mxu2 %v376_v38  ;;  %606 = vmatpush.msrb.mxu3 %v939_v52 }
  0x4b   :  { %514 = vmatpush.msrb.mxu1 %v317_v14 }
  0x4c   :  { %561 = vmatpush.msrb.mxu2 %v382_v43  ;;  %608 = vmatpush.msrb.mxu3 %v942_v58 }
  0x4d   :  { %516 = vmatpush.msrb.mxu1 %v319_v33 }
  0x4e   :  { %565 = vmatpush.msrb.mxu2 %v388_v47  ;;  %610 = vmatpush.msrb.mxu3 %v953_v62 }
  0x4f   :  { %518 = vmatpush.msrb.mxu1 %v321_v40 }
  0x50   :  { %569 = vmatpush.msrb.mxu2 %v394_v49  ;;  %612 = vmatpush.msrb.mxu3 %v959_v2 }
  0x52   :  { %573 = vmatpush.msrb.mxu2 %v400_v54  ;;  %614 = vmatpush.msrb.mxu3 %v961_v6  ;;  %v693_v6 = vld [vmem:[%s1144_s4] ss:$0 sm:$0xff] }
  0x54   :  { %577 = vmatpush.msrb.mxu2 %v406_v22  ;;  %616 = vmatpush.msrb.mxu3 %v975_v31 }
  0x56   :  { %581 = vmatpush.msrb.mxu2 %v412_v21  ;;  %618 = vmatpush.msrb.mxu3 %v1006_v45  ;;  %v695_v21 = vld [vmem:[%s1146_s6] ss:$0 sm:$0xff] }
  0x58   :  { %585 = vmatpush.msrb.mxu2 %v418_v42  ;;  %620 = vmatpush.msrb.mxu3 %v1008_v15 }
  0x5a   :  { %589 = vmatpush.msrb.mxu2 %v424_v24  ;;  %622 = vmatpush.msrb.mxu3 %v317_v14 }
  0x5c   :  { %624 = vmatpush.msrb.mxu3 %v319_v33 }
  0x5e   :  { %626 = vmatpush.msrb.mxu3 %v321_v40 }
  0x99   :  { %v111_v18 = vpop.f32.mrf.mxu0 }
  0x9a   :  { %v112_v26 = vadd.f32 %v692_v19, %v111_v18 }
  0x9d   :  { %v152_v20 = vpop.f32.mrf.mxu1 }
  0x9e   :  { %v153_v28 = vadd.f32 %v152_v20, %v112_v26 }
  0xa1   :  { %v182_v27 = vpop.f32.mrf.mxu0 }
  0xa2   :  { %v183_v35 = vadd.f32 %v182_v27, %v153_v28 }
  0xa5   :  { %v209_v34 = vpop.f32.mrf.mxu1 }
  0xa6   :  { %v210_v36 = vadd.f32 %v209_v34, %v183_v35 }
  0xa9   :  { %v242_v50 = vpop.f32.mrf.mxu0 }
  0xaa   :  { %v243_v51 = vadd.f32 %v242_v50, %v210_v36 }
  0xad   :  { %v267_v52 = vpop.f32.mrf.mxu1 }
  0xae   :  { %v268_v58 = vadd.f32 %v267_v52, %v243_v51 }
  0xb0   :  { %v270_v59 = vmax.f32 %v268_v58, 0.0 }
  0xb2   :  { %v323_v60 = vand.u32 4294901760, %v270_v59 }
  0xb4   :  { %v324_v61 = vsub.f32 %v270_v59, %v323_v60  ;;  %429 = vmatmul.f32.vlgmr.msra.gmra.mxu3 %v323_v60 }
  0xb6   :  { %483 = vmatmul.f32.vlgmr.msrb.gmra.mxu0 %v324_v61  ;;  %v325_v62 = vand.u32 4294901760, %v324_v61 }
  0xb8   :  { %522 = vmatmul.f32.vlgmr.msrb.gmra.mxu1 %v325_v62  ;;  %v326_v1 = vsub.f32 %v324_v61, %v325_v62 }
  0xba   :  { %v327_v2 = vand.u32 4294901760, %v326_v1 }
  0xbc   :  { %328 = vmatmul.f32.vlgmr.msra.gmra.mxu2 %v327_v2  ;;  %628 = vmatmul.f32.vlgmr.msrb.gmra.mxu3 %v323_v60 }
  0xc4   :  { %591 = vmatmul.f32.vlgmr.msrb.gmra.mxu2 %v323_v60 }
 0x133   :  { %v484_v29 = vpop.f32.mrf.mxu0 }
 0x135   :  { %v523_v38 = vpop.f32.mrf.mxu1 }
 0x137   :  { %v430_v7 = vpop.f32.mrf.mxu3 }
 0x13f   :  { %v329_v9 = vpop.f32.mrf.mxu2  ;;  %v629_v15 = vpop.f32.mrf.mxu3 }
 0x140   :  { %v330_v10 = vadd.f32 %v693_v6, %v329_v9 }
 0x142   :  { %v431_v12 = vadd.f32 %v430_v7, %v330_v10 }
 0x144   :  { %v485_v31 = vadd.f32 %v484_v29, %v431_v12 }
 0x146   :  { %v524_v43 = vadd.f32 %v523_v38, %v485_v31 }
 0x147   :  { %v592_v44 = vpop.f32.mrf.mxu2 }
 0x148   :  { %v593_v45 = vadd.f32 %v592_v44, %v524_v43 }
 0x14a   :  { %v630_v47 = vadd.f32 %v629_v15, %v593_v45 }
 0x14c   :  { %v635_v48 = vsel %vm634_vm1, %v630_v47, 0.0 }
 0x14d   :  { %636 = vadd.xlane.f32.xlu0 %v635_v48 }
 0x1c0   :  { %v637_v49 = vpop.xlane.xlu0 %636 }
 0x1c1   :  { %v638_v53 = vmul.f32 0.015625, %v637_v49 }
 0x1c3   :  { %v639_v54 = vsub.f32 %v635_v48, %v638_v53 }
 0x1c5   :  { %v640_v56 = vsel %vm634_vm1, %v639_v54, 0.0 }
 0x1c6   :  { %v641_v22 = vmul.f32 %v640_v56, %v640_v56 }
 0x1c8   :  { %642 = vadd.xlane.f32.xlu0 %v641_v22 }
 0x23b   :  { %v643_v30 = vpop.xlane.xlu0 %642 }
 0x23c   :  { %v644_v3 = vmul.f32 0.015625, %v643_v30 }
 0x23e   :  { %v645_v57 = vadd.f32 1e-05, %v644_v3 }
 0x240   :  { %696 = vrsqrt.f32 %v645_v57  ;;  %vm652_vm3 = vweird.f32 %v645_v57 }
 0x246   :  { %v697_v63 = vpop.eup %696 }
 0x247   :  { %v647_v4 = vmul.f32 %v697_v63, %v645_v57  ;;  %vm653_vm2 = vweird.f32 %v697_v63 }
 0x248   :  { %vm654_vm4 = vmor %vm652_vm3, %vm653_vm2 }
 0x249   :  { %v648_v5 = vmul.f32 %v697_v63, %v647_v4 }
 0x24b   :  { %v649_v8 = vmul.f32 0.5, %v648_v5 }
 0x24d   :  { %v650_v14 = vsub.f32 1.5, %v649_v8 }
 0x24f   :  { %v651_v0 = vmul.f32 %v697_v63, %v650_v14 }
 0x251   :  { %v655_v33 = vsel %vm654_vm4, %v697_v63, %v651_v0 }
 0x252   :  { %v656_v37 = vmul.f32 %v655_v33, %v640_v56 }
 0x254   :  { %v661_v39 = vmul.f32 %v694_v32, %v656_v37 }
 0x256   :  { %v666_v40 = vadd.f32 %v695_v21, %v661_v39 }
 0x258   :  { %667 = vst [vmem:[#allocation8] sm:$0xff] %v666_v40 }
 0x259   :  { %678 = dma.vmem_to_hbm [thread:$0]  %s674_s22, 128, %s676_s25, [#allocation4]  }
 0x25a   :  { %798 = dma.done.wait [#allocation4], 128  }
 0x25b   :  { %799 = vsyncadd [#allocation4], 4294967168 }
 0x25c   :  { %683 = vsyncpa [#allocation3], 1 }
 0x25d   :  { %684 = vsyncpa [#allocation6], 1 }
 0x25e   :  { %685 = vsyncpa [#allocation4], 1 }

</bundles_post_ra>
